<compile_context>
chip_gen: v7x
topology: tpu7x:2x2x1
jax: 0.10.0
libtpu: 0.0.40
codegen_flags: <defaults>
</compile_context>

<pallas_src>
import numpy as np
import jax
import jax.numpy as jnp
from jax.experimental import pallas as pl
from jax.experimental.pallas import tpu as pltpu

EPSILON = 1e-4  # module default


def _choose_channel_batch(bc, w):
    """Largest per-step channel batch G with G | BC, G*W ~ 128 lanes and (when
    possible) >= 2 grid steps so both v7x TensorCores stay busy."""
    g = max(1, min(bc, max(1, 128 // max(1, w))))
    if bc // g < 2 and g > 1:
        g = max(1, g // 2)
    while bc % g:
        g -= 1
    return g


# ----------------------------------------------------------------------------
# Kernel: one batch of G channels (target & recon) per grid step
# ----------------------------------------------------------------------------
def _make_kernel(eps, inv_pq):
    eps = np.float32(eps)
    inv_pq = np.float32(inv_pq)

    def kernel(zx_ref, zy_ref, cph_ref, sph_ref, dc_ref, ds_ref, selw_ref,
               out_ref):
        zx = zx_ref[0]              # (H, G*W)  target, channels along lanes
        zy = zy_ref[0]              # (H, G*W)  recon
        cph = cph_ref[...]          # (P, H)    cos rows, zero-pad folded in
        sph = sph_ref[...]          # (P, H)    sin rows
        dc = dc_ref[...]            # (G*W, G*Wh) block-diag cos (half-spectrum)
        ds = ds_ref[...]            # (G*W, G*Wh) block-diag sin

        def mm(a, b):
            return jnp.dot(a, b, preferred_element_type=jnp.float32)

        # ---- forward 2-D DFT (padding folded into the matrices) ------------
        # stage 1: row transform (contract H), all G channels at once on lanes
        txr = mm(cph, zx)
        txi = -mm(sph, zx)
        tyr = mm(cph, zy)
        tyi = -mm(sph, zy)
        # stage 2: column transform to the Wh=Q//2+1 Hermitian bins for all
        # channels in one block-diagonal matmul (full K=N=G*W lane width)
        mdt = dc.dtype
        fxr = mm(txr.astype(mdt), dc) + mm(txi.astype(mdt), ds)
        fxi = mm(txi.astype(mdt), dc) - mm(txr.astype(mdt), ds)
        fyr = mm(tyr.astype(mdt), dc) + mm(tyi.astype(mdt), ds)
        fyi = mm(tyi.astype(mdt), dc) - mm(tyr.astype(mdt), ds)

        # ---- Wiener spectral division (reverse: x = target, y = recon) -----
        cr = fxr * fyr + fxi * fyi            # Re{F_x conj(F_y)}
        ci = fxi * fyr - fxr * fyi            # Im{F_x conj(F_y)}
        den = fxr * fxr + fxi * fxi + eps     # |F_x|^2 + eps
        dr = (cr + eps) / den
        di = ci / den

        # ---- loss directly in the frequency domain (Parseval) --------------
        # ||v - delta||^2 = sum(v^2) - 2*v_rolled[P//2,Q//2] + 1 and the rolled
        # centre equals the un-rolled v[0,0].  The Hermitian weights
        # (1,2,...,2) and the per-channel lane segmentation are folded into
        # the selector matrix selw (G*Wh, G).
        selw = selw_ref[...]
        s2 = jnp.sum(mm(dr * dr + di * di, selw), axis=0, keepdims=True)  # (1,G)
        sc = jnp.sum(mm(dr, selw), axis=0, keepdims=True)                 # (1,G)
        val = s2 * inv_pq - 2.0 * (sc * inv_pq) + 1.0
        f = 0.5 * jnp.sqrt(jnp.maximum(val, 0.0))
        out_ref[0] = f.astype(out_ref.dtype)

    return kernel


# ----------------------------------------------------------------------------
# Wrapper
# ----------------------------------------------------------------------------
def wiener_similarity_metric(recon, target, epsilon=EPSILON,
                             compute_dtype=jnp.float32):
    """Returns f[b, c] = 0.5 * ||v_{b,c} - delta||_2 (module forward, defaults)."""
    assert recon.shape == target.shape
    B, C, H, W = recon.shape
    # TODO(synk): for H != W the module's pad_signal swaps the H/W pad amounts
    # (pad-index reorder [2,3,4,5,0,1]); only the square case is supported here.
    assert H == W, "only square spatial dims are supported"
    P, Q = 2 * H - 1, 2 * W - 1            # get_filter_shape -> [C, 2H-1, 2W-1]
    Wh = Q // 2 + 1                        # Q is always odd
    BC = B * C

    G = _choose_channel_batch(BC, W)
    nsteps = BC // G
    Lg, Lf = G * W, G * Wh

    # ---- host-side constants (float64 -> compute dtype) ---------------------
    r0 = (Q - W) // 2                      # pad offset on the row axis
    c0 = (P - H) // 2                      # pad offset on the column axis
    ang_p = 2.0 * np.pi * np.outer(np.arange(P), np.arange(H) + r0) / P
    cph, sph = np.cos(ang_p), np.sin(ang_p)                    # (P, H)
    ang_q = 2.0 * np.pi * np.outer(np.arange(W) + c0, np.arange(Wh)) / Q
    cqw, sqw = np.cos(ang_q), np.sin(ang_q)                    # (W, Wh)

    dc = np.zeros((Lg, Lf), np.float64)
    ds = np.zeros((Lg, Lf), np.float64)
    selw = np.zeros((Lf, G), np.float64)
    wk = np.ones(Wh, np.float64)
    wk[1:] = 2.0                                               # Hermitian weights
    for g in range(G):
        dc[g * W:(g + 1) * W, g * Wh:(g + 1) * Wh] = cqw
        ds[g * W:(g + 1) * W, g * Wh:(g + 1) * Wh] = sqw
        selw[g * Wh:(g + 1) * Wh, g] = wk

    # ---- lane-major channel layout: (nsteps, H, G*W), no zero padding -------
    def to_lane_layout(a):
        a = a.astype(compute_dtype).reshape(nsteps, G, H, W)
        return jnp.transpose(a, (0, 2, 1, 3)).reshape(nsteps, H, Lg)

    zx = to_lane_layout(target)            # mode='reverse': x = target
    zy = to_lane_layout(recon)             #                 y = recon

    cd = lambda a: jnp.asarray(a, compute_dtype)
    kernel = _make_kernel(float(epsilon), 1.0 / (P * Q))

    def full(shp):
        return pl.BlockSpec(shp, lambda s: (0,) * len(shp))

    out = pl.pallas_call(
        kernel,
        out_shape=jax.ShapeDtypeStruct((nsteps, 1, G), jnp.float32),
        grid=(nsteps,),
        in_specs=[
            pl.BlockSpec((1, H, Lg), lambda s: (s, 0, 0)),     # target block
            pl.BlockSpec((1, H, Lg), lambda s: (s, 0, 0)),     # recon block
            full((P, H)), full((P, H)),                        # cph, sph
            full((Lg, Lf)), full((Lg, Lf)),                    # dc, ds
            full((Lf, G)),                                     # selw (f32)
        ],
        out_specs=pl.BlockSpec((1, 1, G), lambda s: (s, 0, 0)),
        compiler_params=pltpu.CompilerParams(
            dimension_semantics=("parallel",)),
    )(zx, zy, cd(cph), cd(sph), cd(dc), cd(ds), jnp.asarray(selw, jnp.float32))

    return out[:, 0, :].reshape(B, C)


# ----------------------------------------------------------------------------
# Pure-JAX reference (jnp.fft) used only as a sanity check
# ----------------------------------------------------------------------------
def _reference_jax(recon, target, epsilon=EPSILON):
    B, C, H, W = recon.shape
    P, Q = 2 * H - 1, 2 * W - 1
    th, tw = P - H, Q - W
    h1, w1 = th // 2, tw // 2
    # module's pad_signal applies the H-pads to W and vice versa
    pad = ((0, 0), (0, 0), (w1, tw - w1), (h1, th - h1))
    x = jnp.pad(target.astype(jnp.float32), pad)
    y = jnp.pad(recon.astype(jnp.float32), pad)
    Fx = jnp.fft.fftn(x, axes=(-2, -1))
    Fy = jnp.fft.fftn(y, axes=(-2, -1))
    Fd = (Fx * jnp.conj(Fy) + epsilon) / (Fx * jnp.conj(Fx) + epsilon)
    rolled = jnp.fft.irfftn(Fd[..., : Q // 2 + 1], s=(P, Q), axes=(-2, -1))
    v = jnp.roll(rolled, (-(P // 2) - 1, -(Q // 2) - 1), axis=(-2, -1))
    delta = jnp.zeros((P, Q), jnp.float32).at[P // 2, Q // 2].set(1.0)
    diff = v - delta
    return 0.5 * jnp.sqrt(jnp.sum(diff * diff, axis=(-2, -1)))


if __name__ == "__main__":
    key = jax.random.PRNGKey(0)
    k1, k2 = jax.random.split(key)
    B, C, H, W = 2, 4, 16, 16
    recon = jax.random.normal(k1, (B, C, H, W), dtype=jnp.float32)
    target = jax.random.normal(k2, (B, C, H, W), dtype=jnp.float32)

    out = jax.block_until_ready(wiener_similarity_metric(recon, target))
    assert out.shape == (B, C), out.shape

    ref = jax.block_until_ready(_reference_jax(recon, target))
    if not jnp.allclose(out, ref, rtol=5e-2, atol=5e-2):
        raise AssertionError(f"kernel/reference mismatch:\n{out}\n{ref}")

    print("KERNEL_OK")
</pallas_src>

<mosaic_0001>
module attributes {stable_mosaic.version = 11 : i64} {
  func.func @kernel(%arg0: i32, %arg1: memref<1x16x64xf32, #tpu.memory_space<vmem>>, %arg2: memref<1x16x64xf32, #tpu.memory_space<vmem>>, %arg3: memref<31x16xf32, #tpu.memory_space<vmem>>, %arg4: memref<31x16xf32, #tpu.memory_space<vmem>>, %arg5: memref<64x64xf32, #tpu.memory_space<vmem>>, %arg6: memref<64x64xf32, #tpu.memory_space<vmem>>, %arg7: memref<64x4xf32, #tpu.memory_space<vmem>>, %arg8: memref<1x1x4xf32, #tpu.memory_space<vmem>>) attributes {dimension_semantics = [#tpu.dimension_semantics<parallel>], iteration_bounds = array<i64: 2>, scalar_prefetch = 0 : i64, scratch_operands = 0 : i64, tpu.core_type = #tpu.core_type<tc>, window_params = [{transform_indices = @transform_0, window_bounds = array<i64: 1, 16, 64>}, {transform_indices = @transform_1, window_bounds = array<i64: 1, 16, 64>}, {pipeline_mode = #tpu.pipeline_mode<synchronous>, transform_indices = @transform_2, window_bounds = array<i64: 31, 16>}, {pipeline_mode = #tpu.pipeline_mode<synchronous>, transform_indices = @transform_3, window_bounds = array<i64: 31, 16>}, {pipeline_mode = #tpu.pipeline_mode<synchronous>, transform_indices = @transform_4, window_bounds = array<i64: 64, 64>}, {pipeline_mode = #tpu.pipeline_mode<synchronous>, transform_indices = @transform_5, window_bounds = array<i64: 64, 64>}, {pipeline_mode = #tpu.pipeline_mode<synchronous>, transform_indices = @transform_6, window_bounds = array<i64: 64, 4>}, {transform_indices = @transform_7, window_bounds = array<i64: 1, 1, 4>}]} {
    %c0 = arith.constant 0 : index
    %c0_0 = arith.constant 0 : index
    %c0_1 = arith.constant 0 : index
    %0 = vector.load %arg1[%c0, %c0_0, %c0_1] : memref<1x16x64xf32, #tpu.memory_space<vmem>>, vector<1x16x64xf32>
    %1 = vector.shape_cast %0 : vector<1x16x64xf32> to vector<16x64xf32>
    %c0_2 = arith.constant 0 : index
    %c0_3 = arith.constant 0 : index
    %c0_4 = arith.constant 0 : index
    %2 = vector.load %arg2[%c0_2, %c0_3, %c0_4] : memref<1x16x64xf32, #tpu.memory_space<vmem>>, vector<1x16x64xf32>
    %3 = vector.shape_cast %2 : vector<1x16x64xf32> to vector<16x64xf32>
    %c0_5 = arith.constant 0 : index
    %c0_6 = arith.constant 0 : index
    %4 = vector.load %arg3[%c0_5, %c0_6] : memref<31x16xf32, #tpu.memory_space<vmem>>, vector<31x16xf32>
    %c0_7 = arith.constant 0 : index
    %c0_8 = arith.constant 0 : index
    %5 = vector.load %arg4[%c0_7, %c0_8] : memref<31x16xf32, #tpu.memory_space<vmem>>, vector<31x16xf32>
    %c0_9 = arith.constant 0 : index
    %c0_10 = arith.constant 0 : index
    %6 = vector.load %arg5[%c0_9, %c0_10] : memref<64x64xf32, #tpu.memory_space<vmem>>, vector<64x64xf32>
    %c0_11 = arith.constant 0 : index
    %c0_12 = arith.constant 0 : index
    %7 = vector.load %arg6[%c0_11, %c0_12] : memref<64x64xf32, #tpu.memory_space<vmem>>, vector<64x64xf32>
    %cst = arith.constant dense<0.000000e+00> : vector<31x64xf32>
    %8 = tpu.matmul %4, %1, %cst {dimension_numbers = #tpu.dot_dimension_numbers<[1], [0], [0], [1], [0, 0, 1, 1], [], []>} : vector<31x16xf32>, vector<16x64xf32>, vector<31x64xf32> -> vector<31x64xf32>
    %cst_13 = arith.constant dense<0.000000e+00> : vector<31x64xf32>
    %9 = tpu.matmul %5, %1, %cst_13 {dimension_numbers = #tpu.dot_dimension_numbers<[1], [0], [0], [1], [0, 0, 1, 1], [], []>} : vector<31x16xf32>, vector<16x64xf32>, vector<31x64xf32> -> vector<31x64xf32>
    %cst_14 = arith.constant 0.000000e+00 : f32
    %10 = vector.broadcast %cst_14 : f32 to vector<31x64xf32>
    %11 = arith.subf %10, %9 : vector<31x64xf32>
    %cst_15 = arith.constant dense<0.000000e+00> : vector<31x64xf32>
    %12 = tpu.matmul %4, %3, %cst_15 {dimension_numbers = #tpu.dot_dimension_numbers<[1], [0], [0], [1], [0, 0, 1, 1], [], []>} : vector<31x16xf32>, vector<16x64xf32>, vector<31x64xf32> -> vector<31x64xf32>
    %cst_16 = arith.constant dense<0.000000e+00> : vector<31x64xf32>
    %13 = tpu.matmul %5, %3, %cst_16 {dimension_numbers = #tpu.dot_dimension_numbers<[1], [0], [0], [1], [0, 0, 1, 1], [], []>} : vector<31x16xf32>, vector<16x64xf32>, vector<31x64xf32> -> vector<31x64xf32>
    %cst_17 = arith.constant 0.000000e+00 : f32
    %14 = vector.broadcast %cst_17 : f32 to vector<31x64xf32>
    %15 = arith.subf %14, %13 : vector<31x64xf32>
    %cst_18 = arith.constant dense<0.000000e+00> : vector<31x64xf32>
    %16 = tpu.matmul %8, %6, %cst_18 {dimension_numbers = #tpu.dot_dimension_numbers<[1], [0], [0], [1], [0, 0, 1, 1], [], []>} : vector<31x64xf32>, vector<64x64xf32>, vector<31x64xf32> -> vector<31x64xf32>
    %cst_19 = arith.constant dense<0.000000e+00> : vector<31x64xf32>
    %17 = tpu.matmul %11, %7, %cst_19 {dimension_numbers = #tpu.dot_dimension_numbers<[1], [0], [0], [1], [0, 0, 1, 1], [], []>} : vector<31x64xf32>, vector<64x64xf32>, vector<31x64xf32> -> vector<31x64xf32>
    %18 = arith.addf %16, %17 : vector<31x64xf32>
    %cst_20 = arith.constant dense<0.000000e+00> : vector<31x64xf32>
    %19 = tpu.matmul %11, %6, %cst_20 {dimension_numbers = #tpu.dot_dimension_numbers<[1], [0], [0], [1], [0, 0, 1, 1], [], []>} : vector<31x64xf32>, vector<64x64xf32>, vector<31x64xf32> -> vector<31x64xf32>
    %cst_21 = arith.constant dense<0.000000e+00> : vector<31x64xf32>
    %20 = tpu.matmul %8, %7, %cst_21 {dimension_numbers = #tpu.dot_dimension_numbers<[1], [0], [0], [1], [0, 0, 1, 1], [], []>} : vector<31x64xf32>, vector<64x64xf32>, vector<31x64xf32> -> vector<31x64xf32>
    %21 = arith.subf %19, %20 : vector<31x64xf32>
    %cst_22 = arith.constant dense<0.000000e+00> : vector<31x64xf32>
    %22 = tpu.matmul %12, %6, %cst_22 {dimension_numbers = #tpu.dot_dimension_numbers<[1], [0], [0], [1], [0, 0, 1, 1], [], []>} : vector<31x64xf32>, vector<64x64xf32>, vector<31x64xf32> -> vector<31x64xf32>
    %cst_23 = arith.constant dense<0.000000e+00> : vector<31x64xf32>
    %23 = tpu.matmul %15, %7, %cst_23 {dimension_numbers = #tpu.dot_dimension_numbers<[1], [0], [0], [1], [0, 0, 1, 1], [], []>} : vector<31x64xf32>, vector<64x64xf32>, vector<31x64xf32> -> vector<31x64xf32>
    %24 = arith.addf %22, %23 : vector<31x64xf32>
    %cst_24 = arith.constant dense<0.000000e+00> : vector<31x64xf32>
    %25 = tpu.matmul %15, %6, %cst_24 {dimension_numbers = #tpu.dot_dimension_numbers<[1], [0], [0], [1], [0, 0, 1, 1], [], []>} : vector<31x64xf32>, vector<64x64xf32>, vector<31x64xf32> -> vector<31x64xf32>
    %cst_25 = arith.constant dense<0.000000e+00> : vector<31x64xf32>
    %26 = tpu.matmul %12, %7, %cst_25 {dimension_numbers = #tpu.dot_dimension_numbers<[1], [0], [0], [1], [0, 0, 1, 1], [], []>} : vector<31x64xf32>, vector<64x64xf32>, vector<31x64xf32> -> vector<31x64xf32>
    %27 = arith.subf %25, %26 : vector<31x64xf32>
    %28 = arith.mulf %18, %24 : vector<31x64xf32>
    %29 = arith.mulf %21, %27 : vector<31x64xf32>
    %30 = arith.addf %28, %29 : vector<31x64xf32>
    %31 = arith.mulf %21, %24 : vector<31x64xf32>
    %32 = arith.mulf %18, %27 : vector<31x64xf32>
    %33 = arith.subf %31, %32 : vector<31x64xf32>
    %34 = arith.mulf %18, %18 : vector<31x64xf32>
    %35 = arith.mulf %21, %21 : vector<31x64xf32>
    %36 = arith.addf %34, %35 : vector<31x64xf32>
    %cst_26 = arith.constant 9.99999974E-5 : f32
    %37 = vector.broadcast %cst_26 : f32 to vector<31x64xf32>
    %38 = arith.addf %36, %37 : vector<31x64xf32>
    %cst_27 = arith.constant 9.99999974E-5 : f32
    %39 = vector.broadcast %cst_27 : f32 to vector<31x64xf32>
    %40 = arith.addf %30, %39 : vector<31x64xf32>
    %41 = arith.divf %40, %38 : vector<31x64xf32>
    %42 = arith.divf %33, %38 : vector<31x64xf32>
    %c0_28 = arith.constant 0 : index
    %c0_29 = arith.constant 0 : index
    %43 = vector.load %arg7[%c0_28, %c0_29] : memref<64x4xf32, #tpu.memory_space<vmem>>, vector<64x4xf32>
    %44 = arith.mulf %41, %41 : vector<31x64xf32>
    %45 = arith.mulf %42, %42 : vector<31x64xf32>
    %46 = arith.addf %44, %45 : vector<31x64xf32>
    %cst_30 = arith.constant dense<0.000000e+00> : vector<31x4xf32>
    %47 = tpu.matmul %46, %43, %cst_30 {dimension_numbers = #tpu.dot_dimension_numbers<[1], [0], [0], [1], [0, 0, 1, 1], [], []>} : vector<31x64xf32>, vector<64x4xf32>, vector<31x4xf32> -> vector<31x4xf32>
    %cst_31 = arith.constant dense<0.000000e+00> : vector<4xf32>
    %48 = vector.multi_reduction <add>, %47, %cst_31 [0] : vector<31x4xf32> to vector<4xf32>
    %49 = vector.shape_cast %48 : vector<4xf32> to vector<1x4xf32>
    %cst_32 = arith.constant dense<0.000000e+00> : vector<31x4xf32>
    %50 = tpu.matmul %41, %43, %cst_32 {dimension_numbers = #tpu.dot_dimension_numbers<[1], [0], [0], [1], [0, 0, 1, 1], [], []>} : vector<31x64xf32>, vector<64x4xf32>, vector<31x4xf32> -> vector<31x4xf32>
    %cst_33 = arith.constant dense<0.000000e+00> : vector<4xf32>
    %51 = vector.multi_reduction <add>, %50, %cst_33 [0] : vector<31x4xf32> to vector<4xf32>
    %52 = vector.shape_cast %51 : vector<4xf32> to vector<1x4xf32>
    %cst_34 = arith.constant 0.00104058278 : f32
    %53 = vector.broadcast %cst_34 : f32 to vector<1x4xf32>
    %54 = arith.mulf %49, %53 : vector<1x4xf32>
    %cst_35 = arith.constant 0.00104058278 : f32
    %55 = vector.broadcast %cst_35 : f32 to vector<1x4xf32>
    %56 = arith.mulf %52, %55 : vector<1x4xf32>
    %cst_36 = arith.constant 2.000000e+00 : f32
    %57 = vector.broadcast %cst_36 : f32 to vector<1x4xf32>
    %58 = arith.mulf %57, %56 : vector<1x4xf32>
    %59 = arith.subf %54, %58 : vector<1x4xf32>
    %cst_37 = arith.constant 1.000000e+00 : f32
    %60 = vector.broadcast %cst_37 : f32 to vector<1x4xf32>
    %61 = arith.addf %59, %60 : vector<1x4xf32>
    %cst_38 = arith.constant 0.000000e+00 : f32
    %62 = vector.broadcast %cst_38 : f32 to vector<1x4xf32>
    %63 = arith.maximumf %61, %62 : vector<1x4xf32>
    %64 = math.sqrt %63 : vector<1x4xf32>
    %cst_39 = arith.constant 5.000000e-01 : f32
    %65 = vector.broadcast %cst_39 : f32 to vector<1x4xf32>
    %66 = arith.mulf %65, %64 : vector<1x4xf32>
    %c0_40 = arith.constant 0 : index
    %c0_41 = arith.constant 0 : index
    %c0_42 = arith.constant 0 : index
    %67 = vector.load %arg8[%c0_40, %c0_41, %c0_42] : memref<1x1x4xf32, #tpu.memory_space<vmem>>, vector<1x1x4xf32>
    %68 = vector.shape_cast %67 : vector<1x1x4xf32> to vector<1x4xf32>
    %69 = vector.shape_cast %66 : vector<1x4xf32> to vector<1x1x4xf32>
    tpu.vector_store %arg8[%c0_40, %c0_41, %c0_42], %69 {strides = array<i32>} : memref<1x1x4xf32, #tpu.memory_space<vmem>>, vector<1x1x4xf32>,
    return
  }
  func.func @transform_0(%arg0: i32) -> (i32, i32, i32) {
    %c0_i32 = arith.constant 0 : i32
    %c0_i32_0 = arith.constant 0 : i32
    %c0_i32_1 = arith.constant 0 : i32
    return %arg0, %c0_i32, %c0_i32_0 : i32, i32, i32
  }
  func.func @transform_1(%arg0: i32) -> (i32, i32, i32) {
    %c0_i32 = arith.constant 0 : i32
    %c0_i32_0 = arith.constant 0 : i32
    %c0_i32_1 = arith.constant 0 : i32
    return %arg0, %c0_i32, %c0_i32_0 : i32, i32, i32
  }
  func.func @transform_2(%arg0: i32) -> (i32, i32) {
    %c0_i32 = arith.constant 0 : i32
    %c0_i32_0 = arith.constant 0 : i32
    %c0_i32_1 = arith.constant 0 : i32
    return %c0_i32, %c0_i32_0 : i32, i32
  }
  func.func @transform_3(%arg0: i32) -> (i32, i32) {
    %c0_i32 = arith.constant 0 : i32
    %c0_i32_0 = arith.constant 0 : i32
    %c0_i32_1 = arith.constant 0 : i32
    return %c0_i32, %c0_i32_0 : i32, i32
  }
  func.func @transform_4(%arg0: i32) -> (i32, i32) {
    %c0_i32 = arith.constant 0 : i32
    %c0_i32_0 = arith.constant 0 : i32
    %c0_i32_1 = arith.constant 0 : i32
    return %c0_i32, %c0_i32_0 : i32, i32
  }
  func.func @transform_5(%arg0: i32) -> (i32, i32) {
    %c0_i32 = arith.constant 0 : i32
    %c0_i32_0 = arith.constant 0 : i32
    %c0_i32_1 = arith.constant 0 : i32
    return %c0_i32, %c0_i32_0 : i32, i32
  }
  func.func @transform_6(%arg0: i32) -> (i32, i32) {
    %c0_i32 = arith.constant 0 : i32
    %c0_i32_0 = arith.constant 0 : i32
    %c0_i32_1 = arith.constant 0 : i32
    return %c0_i32, %c0_i32_0 : i32, i32
  }
  func.func @transform_7(%arg0: i32) -> (i32, i32, i32) {
    %c0_i32 = arith.constant 0 : i32
    %c0_i32_0 = arith.constant 0 : i32
    %c0_i32_1 = arith.constant 0 : i32
    return %arg0, %c0_i32, %c0_i32_0 : i32, i32, i32
  }
}

</mosaic_0001>

<bundles_post_ra>
// kernel: tpu_custom_call.1
= control target key start
LH: loop header
LB: loop body
LE: loop exit
PB: predicated region body
PF: predicated region fallthrough
CT: control target
= control target key end

     0   :  { %12 = vsyncpa [#allocation3], 0  ;;  %s3130_s0 = inlined_call_operand.vmem [shape: f32[2,16,64], index: 0, kind: input, shape index: {}]   ;;  %s3131_s1 = inlined_call_operand.hbm [shape: f32[2,16,64], index: 1, kind: input, shape index: {}]   ;;  %s3132_s2 = inlined_call_operand.vmem [shape: f32[31,16], index: 2, kind: input, shape index: {}]   ;;  %s3133_s3 = inlined_call_operand.vmem [shape: f32[31,16], index: 3, kind: input, shape index: {}]   ;;  %s3134_s4 = inlined_call_operand.vmem [shape: f32[64,64], index: 4, kind: input, shape index: {}]   ;;  %s3135_s5 = inlined_call_operand.vmem [shape: f32[64,64], index: 5, kind: input, shape index: {}]   ;;  %s3136_s6 = inlined_call_operand.vmem [shape: f32[64,4], index: 6, kind: input, shape index: {}]   ;;  %s3137_s7 = inlined_call_operand.hbm [shape: f32[2,1,4], index: 7, kind: output, shape index: {}]  }
   0x1   :  { %14 = vsyncpa [#allocation3 + $0x1], 0 }
   0x2   :  { %15 = vsyncpa [#allocation4], 0 }
   0x3   :  { %17 = vsyncpa [#allocation4 + $0x1], 0  ;;  %s2718_s24 = smov 0   ;;  %s2720_s25 = smov 0  }
   0x4   :  { %s2722_s26 = smov 0   ;;  %s2724_s27 = smov 0  }
   0x5 LB: > { %s2739_s28 = sadd.s32 4294967295, %s2672_s27   ;;  %s1859_s29 = sadd.s32 4294967294, %s2672_s27   ;;  %s2672_s27 = sphi %s2724_s27, %s3150_s27   ;;  %s2668_s26 = sphi %s2722_s26, %s3149_s26   ;;  %s2664_s25 = sphi %s2720_s25, %s3148_s25   ;;  %s2660_s24 = sphi %s2718_s24, %s3147_s24  }
   0x6   : > { %s2743_s30 = sadd.s32 1, %s2672_s27   ;;  %s56_s8 = sadd.s32 1, %s2668_s26 }
   0x7   : > { %s53_s9 = ssub.s32 %s2672_s27, %s2743_s30  ;;  %p63_p0 = scmp.ne.s32.totalorder %s2668_s26, %s2664_s25 }
   0x8   : > { %p54_p1 = scmp.eq.s32.totalorder %s53_s9, 0  ;;  %p64_p2 = scmp.eq.s32.totalorder %s2672_s27, 0 }
   0x9   : > { %p69_p3 = scmp.ne.s32.totalorder %s2664_s25, %s2660_s24  ;;  %p70_p4 = scmp.eq.s32.totalorder %s2739_s28, 0 }
   0xa   : > { %s2755_s10 = scalar_select %p54_p1, %s2668_s26, %s56_s8  }
   0xb   : > { %p2757_p5 = por %p64_p2, %p63_p0  ;;  %p2761_p6 = por %p70_p4, %p69_p3 }
   0xc   : > { %p198_p7 = scmp.eq.s32.totalorder %s2739_s28, 1  ;;  %p204_p8 = scmp.eq.s32.totalorder %s1859_s29, 1 }
   0xd   : > { %p2530_p10 = scmp.lt.s32.totalorder %s2672_s27, 2  ;;  %s247_s15 = sand.u32 1, %s2668_s26  }
   0xe   : > { %p2768_p11 = por %p198_p7, %p63_p0  ;;  %p2772_p12 = por %p204_p8, %p69_p3 }
   0xf   : > { %s1928_s16 = sshll.u32 %s2672_s27, 8  ;;  %s1862_s17 = sshll.u32 %s247_s15, 4 }
  0x10   : > { %s3141_s13 = scalar_select %p2768_p11, 1, 0 }
  0x11   : > { %s3142_s14 = scalar_select %p2772_p12, 1, 0 }
  0x12   : > { %s2781_s20 = scalar_lea.hbm %s3131_s1, %s1928_s16  ;;  %s251_s21 = scalar_lea.vmem [#allocation2], %s1862_s17 }
  0x13   : > { %s258_s22 = sshll.u32 %s251_s21, 4  ;;  %p2785_p13 = pnand %p2530_p10, %p2757_p5  ;;  %s2789_s22 = int_to_ptr.vmem [resolvable:$true] %s258_s22 }
  0x14   : > { %s2791_s29 = scalar_lea.sflag [#allocation3], %s247_s15  ;;  %s2576_s8 = scalar_lea.hbm %s2781_s20, 256 }
  0x15   : > { %p2577_p0 = scmp.ne.s32.totalorder %s2781_s20, %s2576_s8  ;;  %p2578_p1 = pneg %p2785_p13 }
  0x16   : > { %s2581_s16 = scalar_lea.hbm %s3131_s1, 512  ;;  %p2582_p4 = scmp.lt.u32.totalorder %s2781_s20, %s3131_s1 }
  0x17   : > { %p2579_p2 = pnand %p2578_p1, %p2577_p0  ;;  %p2583_p5 = scmp.lt.u32.totalorder %s2581_s16, %s2576_s8 }
  0x18   : > { %p2585_p8 = scmp.lt.u32.totalorder %s2576_s8, %s2781_s20 }
  0x19   : > { %p2580_p3 = pneg %p2579_p2  ;;  %p2584_p7 = por %p2583_p5, %p2582_p4 }
  0x1b   : > { %p2586_p10 = por %p2585_p8, %p2584_p7 }
  0x1d   : > { %p2587_p9 = pnand %p2586_p10, %p2580_p3 }
  0x1f   : > { %2590 = shalt.err (!%p2587_p9)
}
  0x20   : > { %s2591_s15 = scalar_lea.vmem %s2789_s22, 256  ;;  %s2674_s19 = smov [#allocation2]  }
  0x21   : > { %p2592_p0 = scmp.ne.s32.totalorder %s2789_s22, %s2591_s15  ;;  %s2596_s21 = sshll.u32 %s2674_s19, 4  ;;  %s2597_s21 = int_to_ptr.vmem [resolvable:$false] %s2596_s21 }
  0x22   : > { %s2598_s9 = scalar_lea.vmem %s2597_s21, 512  ;;  %p2599_p11 = scmp.lt.s32.totalorder %s2789_s22, %s2597_s21 }
  0x23   : > { %p2594_p2 = pnand %p2592_p0, %p2578_p1  ;;  %p2600_p4 = scmp.lt.s32.totalorder %s2598_s9, %s2591_s15 }
  0x25   : > { %p2595_p12 = pneg %p2594_p2  ;;  %p2601_p5 = por %p2600_p4, %p2599_p11 }
  0x27   : > { %p2602_p7 = pnand %p2601_p5, %p2595_p12 }
  0x29   : > { %2605 = shalt.err (!%p2602_p7)
}
  0x2a   : > { %s2675_s8 = smov 128   ;;  %s2676_s11 = smov 8  }
  0x2b   : > { %2525 = dma.hbm_to_vmem [thread:$0]  (!%p2785_p13), %s2781_s20, 256, %s2789_s22, %s2791_s29, %s2675_s8, %s2675_s8, %s2676_s11  }
  0x2c   : > { %p1865_p9 = scmp.ge.s32.totalorder %s2672_s27, 1  ;;  %p266_p1 = scmp.lt.s32.totalorder %s2672_s27, 3 }
  0x2e   : > { %p267_p3 = pnand %p1865_p9, %p266_p1 }
  0x2f   : > { %s2822_s16 = sand.u32 (!%p267_p3), 1, %s2664_s25  }
  0x30   : > { %270 = sbr.rel (%p267_p3) target bundleno = 835 (0x343), region = 48  ;;  %s1866_s17 = sshll.u32 (!%p267_p3), %s2822_s16, 4 }
  0x31   : > { %s273_s18 = scalar_lea.sflag (!%p267_p3), [#allocation3], %s2822_s16  ;;  %s276_s15 = scalar_lea.vmem (!%p267_p3), [#allocation2], %s1866_s17 }
  0x37   : > { %2651 = dma.done.wait (%p2761_p6), %s273_s18, 256  }
  0x38   : > { %2653 = vsyncadd (%p2761_p6), %s273_s18, 4294967040  ;;  %p311_p11 = scmp.lt.s32.totalorder %s2739_s28, 1  ;;  %vm344_vm0 = vcmask 130048   ;;  %v324_v2 = vld [vmem:[%s3133_s3] sm:$0xff]  ;;  %v325_v4 = vld [vmem:[%s3133_s3 + $0x8] sm:$0xff]  ;;  %vm717_vm1 = vcmask 523264  }
  0x39   : > { %2088 = vmatprep.mubr.msk.f32.mxu1 %vm344_vm0, %v324_v2  ;;  %v320_v5 = vld [vmem:[%s3132_s2] sm:$0xff]  ;;  %v321_v6 = vld [vmem:[%s3132_s2 + $0x8] sm:$0xff]  ;;  %v326_v13 = vld [vmem:[%s3133_s3 + $0x10] sm:$0xff]  ;;  %vm1627_vm2 = vcmask 31744   ;;  %vm1633_vm3 = vcmask 30720   ;;  %s1925_s21 = sshll.u32 %s2739_s28, 4 }
  0x3a   : > { %s312_s20 = scalar_select %p311_p11, %s2739_s28, 1  ;;  %v318_v7 = vld [vmem:[%s276_s15] sm:$0xff]  ;;  %v319_v8 = vld [vmem:[%s276_s15 + $0x8] sm:$0xff]  ;;  %2078 = vmatprep.mubr.msk.f32.mxu0 %vm344_vm0, %v320_v5  ;;  %vm1766_vm6 = vcmask 24576  }
  0x3b   : > { %v2342_v9 = vpack.c.bf16 %v319_v8, %v318_v7  ;;  %v336_v10 = vld [vmem:[%s3135_s5] sm:$0xff]  ;;  %v337_v11 = vld [vmem:[%s3135_s5 + $0x8] sm:$0xff]  ;;  %v322_v14 = vld [vmem:[%s3132_s2 + $0x10] sm:$0xff]  ;;  %s310_s9 = scalar_lea.vmem [#allocation5], %s2822_s16  ;;  %s3086_s11 = scalar_lea.hbm %s3137_s7, %s1925_s21 }
  0x3c   : > { %s1929_s22 = sshll.u32 %s312_s20, 4  ;;  %v328_v12 = vld [vmem:[%s3134_s4] sm:$0xff]  ;;  %v329_v15 = vld [vmem:[%s3134_s4 + $0x8] sm:$0xff]  ;;  %v2867_v16 = vpack.c.bf16 %v337_v11, %v336_v10  ;;  %v327_v18 = vld [vmem:[%s3133_s3 + $0x18] sm:$0x7f]  ;;  %s1781_s12 = sshll.u32 %s310_s9, 4  ;;  %s3088_s12 = int_to_ptr.vmem [resolvable:$true] %s1781_s12 }
  0x3d   : > { %s315_s19 = scalar_lea.vmem %s3130_s0, %s1929_s22  ;;  %v2869_v17 = vpack.c.bf16 %v329_v15, %v328_v12  ;;  %v323_v19 = vld [vmem:[%s3132_s2 + $0x18] sm:$0x7f]  ;;  %v338_v20 = vld [vmem:[%s3135_s5 + $0x10] sm:$0xff]  ;;  %v340_v26 = vld [vmem:[%s3135_s5 + $0x20] sm:$0xff]  ;;  %s1769_s17 = scalar_lea.sflag [#allocation4], %s2822_s16 }
  0x3e   : > { %v316_v0 = vld [vmem:[%s315_s19] sm:$0xff]  ;;  %v317_v1 = vld [vmem:[%s315_s19 + $0x8] sm:$0xff]  ;;  %v339_v21 = vld [vmem:[%s3135_s5 + $0x18] sm:$0xff]  ;;  %s2606_s28 = scalar_lea.vmem %s3088_s12, 16  ;;  %p3144_p12 = scmp.ne.s32.totalorder %s3141_s13, 0 }
  0x3f   : > { %v2334_v3 = vpack.c.bf16 %v317_v1, %v316_v0  ;;  %v330_v22 = vld [vmem:[%s3134_s4 + $0x10] sm:$0xff]  ;;  %v331_v23 = vld [vmem:[%s3134_s4 + $0x18] sm:$0xff]  ;;  %v2899_v24 = vpack.c.bf16 %v339_v21, %v338_v20  ;;  %v341_v27 = vld [vmem:[%s3135_s5 + $0x28] sm:$0xff]  ;;  %p2607_p6 = scmp.ne.s32.totalorder %s3088_s12, %s2606_s28  ;;  %s2677_s18 = smov [#allocation5]  }
  0x40   : > { %v2901_v25 = vpack.c.bf16 %v331_v23, %v330_v22  ;;  %v332_v28 = vld [vmem:[%s3134_s4 + $0x20] sm:$0xff]  ;;  %v333_v29 = vld [vmem:[%s3134_s4 + $0x28] sm:$0xff]  ;;  %v2923_v30 = vpack.c.bf16 %v341_v27, %v340_v26  ;;  %v342_v32 = vld [vmem:[%s3135_s5 + $0x30] sm:$0xff]  ;;  %s2610_s20 = sshll.u32 %s2677_s18, 4  ;;  %s2611_s20 = int_to_ptr.vmem [resolvable:$false] %s2610_s20 }
  0x41   : > { %2339 = vmatprep.subr.bf16.mxu1 %v2334_v3  ;;  %2335 = vmatprep.subr.bf16.mxu0 %v2334_v3  ;;  %v2925_v31 = vpack.c.bf16 %v333_v29, %v332_v28  ;;  %v343_v33 = vld [vmem:[%s3135_s5 + $0x38] sm:$0xff]  ;;  %v334_v34 = vld [vmem:[%s3134_s4 + $0x30] sm:$0xff]  ;;  %v1510_v62 = vld [vmem:[%s3136_s6] sm:$0xff]  ;;  %p2608_p13 = pnand %p2607_p6, %p3144_p12  ;;  %s2612_s22 = scalar_lea.vmem %s2611_s20, 32 }
  0x42   : > { %2341 = vmatpush3.bf16.msra.mxu1 %v2334_v3  ;;  %2337 = vmatpush3.bf16.msra.mxu0 %v2334_v3  ;;  %v2944_v35 = vpack.c.bf16 %v343_v33, %v342_v32  ;;  %v335_v36 = vld [vmem:[%s3134_s4 + $0x38] sm:$0xff]  ;;  %v1511_v63 = vld [vmem:[%s3136_s6 + $0x8] sm:$0xff]  ;;  %v1512_v1 = vld [vmem:[%s3136_s6 + $0x10] sm:$0xff]  ;;  %p2613_p10 = scmp.lt.s32.totalorder %s3088_s12, %s2611_s20  ;;  %p2614_p0 = scmp.lt.s32.totalorder %s2612_s22, %s2606_s28 }
  0x43   : > { %2347 = vmatprep.subr.bf16.mxu1 %v2342_v9  ;;  %2343 = vmatprep.subr.bf16.mxu0 %v2342_v9  ;;  %v2949_v37 = vpack.c.bf16 %v335_v36, %v334_v34  ;;  %v2478_v0 = vpack.c.bf16 %v1511_v63, %v1510_v62  ;;  %v1516_v7 = vld [vmem:[%s3136_s6 + $0x30] sm:$0xff]  ;;  %v1517_v8 = vld [vmem:[%s3136_s6 + $0x38] sm:$0xff]  ;;  %p2609_p8 = pneg %p2608_p13 }
  0x44   : > { %p2615_p2 = por %p2614_p0, %p2613_p10 }
  0x45   : > { %2089 = vmatmul.mubr.msk.f32.vlgmr.msra.gmra.mrb[0].mxu1 %vm344_vm0, %v325_v4  ;;  %2079 = vmatmul.mubr.msk.f32.vlgmr.msra.gmra.mrb[0].mxu0 %vm344_vm0, %v321_v6 }
  0x46   : > { %2091 = vmatprep.mubr.msk.f32.mxu1 %vm344_vm0, %v326_v13  ;;  %2081 = vmatprep.mubr.msk.f32.mxu0 %vm344_vm0, %v322_v14  ;;  %p2616_p4 = pnand %p2615_p2, %p2609_p8 }
  0x47   : > { %2349 = vmatpush3.bf16.msra.mxu1 %v2342_v9  ;;  %2345 = vmatpush3.bf16.msra.mxu0 %v2342_v9  ;;  %v2490_v9 = vpack.c.bf16 %v1517_v8, %v1516_v7 }
  0x48   : > { %2351 = vmatprep.subr.bf16.mxu0 %v2867_v16  ;;  %2383 = vmatprep.subr.bf16.mxu1 %v2869_v17 }
  0x49   : > { %2092 = vmatmul.mubr.msk.f32.gmra.mrb[2].mxu1 %vm344_vm0, %v327_v18  ;;  %2082 = vmatmul.mubr.msk.f32.gmra.mrb[2].mxu0 %vm344_vm0, %v323_v19 }
  0x4a   : > { %2108 = vmatprep.mubr.msk.f32.mxu1 %vm344_vm0, %v324_v2  ;;  %2098 = vmatprep.mubr.msk.f32.mxu0 %vm344_vm0, %v320_v5  ;;  %v1513_v2 = vld [vmem:[%s3136_s6 + $0x18] sm:$0xff]  ;;  %v1515_v5 = vld [vmem:[%s3136_s6 + $0x28] sm:$0xff] }
  0x4b   : > { %v2482_v3 = vpack.c.bf16 %v1513_v2, %v1512_v1 }
  0x4d   : > { %2109 = vmatmul.mubr.msk.f32.vlgmr.msra.gmra.mrb[4].mxu1 %vm344_vm0, %v325_v4  ;;  %2099 = vmatmul.mubr.msk.f32.vlgmr.msra.gmra.mrb[4].mxu0 %vm344_vm0, %v321_v6  ;;  %v1514_v4 = vld [vmem:[%s3136_s6 + $0x20] sm:$0xff] }
  0x4e   : > { %2111 = vmatprep.mubr.msk.f32.mxu1 %vm344_vm0, %v326_v13  ;;  %2101 = vmatprep.mubr.msk.f32.mxu0 %vm344_vm0, %v322_v14  ;;  %v2486_v6 = vpack.c.bf16 %v1515_v5, %v1514_v4 }
  0x4f   : > { %2353 = vmatpush3.bf16.msra.mxu0 %v2867_v16  ;;  %2385 = vmatpush3.bf16.msra.mxu1 %v2869_v17 }
  0x50   : > { %2355 = vmatprep.subr.bf16.mxu0 %v2899_v24  ;;  %2387 = vmatprep.subr.bf16.mxu1 %v2901_v25 }
  0x51   : > { %2112 = vmatmul.mubr.msk.f32.gmra.mrb[6].mxu1 %vm344_vm0, %v327_v18  ;;  %2102 = vmatmul.mubr.msk.f32.gmra.mrb[6].mxu0 %vm344_vm0, %v323_v19 }
  0x53   : > { %2357 = vmatpush3.bf16.msra.mxu0 %v2899_v24  ;;  %2389 = vmatpush3.bf16.msra.mxu1 %v2901_v25 }
  0x54   : > { %2359 = vmatprep.subr.bf16.mxu0 %v2923_v30  ;;  %2391 = vmatprep.subr.bf16.mxu1 %v2925_v31 }
  0x57   : > { %2361 = vmatpush3.bf16.msra.mxu0 %v2923_v30  ;;  %2393 = vmatpush3.bf16.msra.mxu1 %v2925_v31 }
  0x58   : > { %2363 = vmatprep.subr.bf16.mxu0 %v2944_v35  ;;  %2395 = vmatprep.subr.bf16.mxu1 %v2949_v37 }
  0x5b   : > { %2365 = vmatpush3.bf16.msra.mxu0 %v2944_v35  ;;  %2397 = vmatpush3.bf16.msra.mxu1 %v2949_v37 }
  0x5c   : > { %2367 = vmatprep.subr.bf16.mxu0 %v2869_v17  ;;  %2399 = vmatprep.subr.bf16.mxu1 %v2867_v16 }
 0x118   : > { %v2090_v38 = vpop.f32.mrb[0].mxu1  ;;  %v2080_v39 = vpop.f32.mrb[0].mxu0 }
 0x119   : > { %v520_v40 = vpop.f32.mrb[1].mxu1  ;;  %v423_v41 = vpop.f32.mrb[1].mxu0  ;;  %v540_v43 = vsub.f32 0.0, %v2090_v38 }
 0x11a   : > { %v539_v42 = vsub.f32 0.0, %v520_v40 }
 0x11c   : > { %2130 = vmatprep.mubr.msk.f32.mxu0 %vm717_vm1, %v539_v42  ;;  %2174 = vmatprep.mubr.msk.f32.mxu1 %vm717_vm1, %v539_v42  ;;  %v2093_v44 = vpop.f32.mrb[2].mxu1  ;;  %v2083_v45 = vpop.f32.mrb[2].mxu0 }
 0x11d   : > { %2131 = vmatmul.mubr.msk.f32.vlgmr.msra.gmra.mrb[8].mxu0 %vm717_vm1, %v540_v43  ;;  %2175 = vmatmul.mubr.msk.f32.vlgmr.msra.gmra.mrb[8].mxu1 %vm717_vm1, %v540_v43  ;;  %v542_v46 = vsub.f32 0.0, %v2093_v44  ;;  %v530_v47 = vpop.f32.mrb[3].mxu1  ;;  %v433_v48 = vpop.f32.mrb[3].mxu0 }
 0x11e   : > { %2369 = vmatpush3.bf16.msra.mxu0 %v2869_v17  ;;  %2401 = vmatpush3.bf16.msra.mxu1 %v2867_v16  ;;  %v541_v49 = vsub.f32 0.0, %v530_v47 }
 0x11f   : > { %2371 = vmatprep.subr.bf16.mxu0 %v2901_v25  ;;  %2403 = vmatprep.subr.bf16.mxu1 %v2899_v24 }
 0x120   : > { %2177 = vmatprep.mubr.msk.f32.mxu1 %vm717_vm1, %v541_v49  ;;  %2133 = vmatprep.mubr.msk.f32.mxu0 %vm717_vm1, %v541_v49  ;;  %v2110_v50 = vpop.f32.mrb[4].mxu1  ;;  %v2967_v51 = vpop.f32.mrb[4].mxu0 }
 0x121   : > { %2178 = vmatmul.mubr.msk.f32.gmra.mrb[10].mxu1 %vm717_vm1, %v542_v46  ;;  %2134 = vmatmul.mubr.msk.f32.gmra.mrb[10].mxu0 %vm717_vm1, %v542_v46  ;;  %v694_v52 = vpop.f32.mrb[5].mxu1  ;;  %v609_v53 = vpop.f32.mrb[5].mxu0  ;;  %v714_v59 = vsub.f32 0.0, %v2110_v50 }
 0x122   : > { %2373 = vmatpush3.bf16.msra.mxu0 %v2901_v25  ;;  %2405 = vmatpush3.bf16.msra.mxu1 %v2899_v24  ;;  %v713_v58 = vsub.f32 0.0, %v694_v52 }
 0x123   : > { %2375 = vmatprep.subr.bf16.mxu0 %v2925_v31  ;;  %2407 = vmatprep.subr.bf16.mxu1 %v2923_v30 }
 0x124   : > { %2152 = vmatprep.mubr.msk.f32.mxu0 %vm717_vm1, %v423_v41  ;;  %2196 = vmatprep.mubr.msk.f32.mxu1 %vm717_vm1, %v423_v41  ;;  %v2113_v54 = vpop.f32.mrb[6].mxu1  ;;  %v2977_v55 = vpop.f32.mrb[6].mxu0 }
 0x125   : > { %v704_v56 = vpop.f32.mrb[7].mxu1  ;;  %v619_v57 = vpop.f32.mrb[7].mxu0  ;;  %v716_v61 = vsub.f32 0.0, %v2113_v54 }
 0x126   : > { %2377 = vmatpush3.bf16.msra.mxu0 %v2925_v31  ;;  %2409 = vmatpush3.bf16.msra.mxu1 %v2923_v30  ;;  %v715_v60 = vsub.f32 0.0, %v704_v56 }
 0x127   : > { %2379 = vmatprep.subr.bf16.mxu0 %v2949_v37  ;;  %2411 = vmatprep.subr.bf16.mxu1 %v2944_v35 }
 0x12a   : > { %2381 = vmatpush3.bf16.msra.mxu0 %v2949_v37  ;;  %2413 = vmatpush3.bf16.msra.mxu1 %v2944_v35 }
 0x12b   : > { %2415 = vmatprep.subr.bf16.mxu0 %v2867_v16  ;;  %2447 = vmatprep.subr.bf16.mxu1 %v2869_v17 }
 0x12d   : > { %2153 = vmatmul.mubr.msk.f32.vlgmr.msra.gmra.mrb[8].mxu0 %vm717_vm1, %v2080_v39  ;;  %2197 = vmatmul.mubr.msk.f32.vlgmr.msra.gmra.mrb[12].mxu1 %vm717_vm1, %v2080_v39 }
 0x12e   : > { %2417 = vmatpush3.bf16.msra.mxu0 %v2867_v16  ;;  %2449 = vmatpush3.bf16.msra.mxu1 %v2869_v17 }
 0x12f   : > { %2155 = vmatprep.mubr.msk.f32.mxu0 %vm717_vm1, %v433_v48  ;;  %2199 = vmatprep.mubr.msk.f32.mxu1 %vm717_vm1, %v433_v48 }
 0x130   : > { %2419 = vmatprep.subr.bf16.mxu0 %v2899_v24  ;;  %2451 = vmatprep.subr.bf16.mxu1 %v2901_v25 }
 0x131   : > { %2156 = vmatmul.mubr.msk.f32.gmra.mrb[10].mxu0 %vm717_vm1, %v2083_v45  ;;  %2200 = vmatmul.mubr.msk.f32.gmra.mrb[14].mxu1 %vm717_vm1, %v2083_v45 }
 0x132   : > { %2421 = vmatpush3.bf16.msra.mxu0 %v2899_v24  ;;  %2453 = vmatpush3.bf16.msra.mxu1 %v2901_v25 }
 0x133   : > { %2423 = vmatprep.subr.bf16.mxu0 %v2923_v30  ;;  %2455 = vmatprep.subr.bf16.mxu1 %v2925_v31 }
 0x134   : > { %2218 = vmatprep.mubr.msk.f32.mxu0 %vm717_vm1, %v713_v58  ;;  %2262 = vmatprep.mubr.msk.f32.mxu1 %vm717_vm1, %v713_v58 }
 0x136   : > { %2425 = vmatpush3.bf16.msra.mxu0 %v2923_v30  ;;  %2457 = vmatpush3.bf16.msra.mxu1 %v2925_v31 }
 0x137   : > { %2427 = vmatprep.subr.bf16.mxu0 %v2944_v35  ;;  %2459 = vmatprep.subr.bf16.mxu1 %v2949_v37 }
 0x13a   : > { %2429 = vmatpush3.bf16.msra.mxu0 %v2944_v35  ;;  %2461 = vmatpush3.bf16.msra.mxu1 %v2949_v37 }
 0x13b   : > { %2431 = vmatprep.subr.bf16.mxu0 %v2869_v17  ;;  %2463 = vmatprep.subr.bf16.mxu1 %v2867_v16 }
 0x13d   : > { %2219 = vmatmul.mubr.msk.f32.vlgmr.msra.gmra.mrb[12].mxu0 %vm717_vm1, %v714_v59  ;;  %2263 = vmatmul.mubr.msk.f32.vlgmr.msra.gmra.mrb[16].mxu1 %vm717_vm1, %v714_v59 }
 0x13e   : > { %2433 = vmatpush3.bf16.msra.mxu0 %v2869_v17  ;;  %2465 = vmatpush3.bf16.msra.mxu1 %v2867_v16 }
 0x13f   : > { %2435 = vmatprep.subr.bf16.mxu0 %v2901_v25  ;;  %2467 = vmatprep.subr.bf16.mxu1 %v2899_v24 }
 0x140   : > { %2265 = vmatprep.mubr.msk.f32.mxu1 %vm717_vm1, %v715_v60  ;;  %2221 = vmatprep.mubr.msk.f32.mxu0 %vm717_vm1, %v715_v60 }
 0x141   : > { %2266 = vmatmul.mubr.msk.f32.gmra.mrb[18].mxu1 %vm717_vm1, %v716_v61  ;;  %2222 = vmatmul.mubr.msk.f32.gmra.mrb[14].mxu0 %vm717_vm1, %v716_v61 }
 0x142   : > { %2437 = vmatpush3.bf16.msra.mxu0 %v2901_v25  ;;  %2469 = vmatpush3.bf16.msra.mxu1 %v2899_v24 }
 0x143   : > { %2439 = vmatprep.subr.bf16.mxu0 %v2925_v31  ;;  %2471 = vmatprep.subr.bf16.mxu1 %v2923_v30 }
 0x144   : > { %2240 = vmatprep.mubr.msk.f32.mxu0 %vm717_vm1, %v609_v53  ;;  %2284 = vmatprep.mubr.msk.f32.mxu1 %vm717_vm1, %v609_v53 }
 0x146   : > { %2441 = vmatpush3.bf16.msra.mxu0 %v2925_v31  ;;  %2473 = vmatpush3.bf16.msra.mxu1 %v2923_v30 }
 0x147   : > { %2443 = vmatprep.subr.bf16.mxu0 %v2949_v37  ;;  %2475 = vmatprep.subr.bf16.mxu1 %v2944_v35 }
 0x14a   : > { %2445 = vmatpush3.bf16.msra.mxu0 %v2949_v37  ;;  %2477 = vmatpush3.bf16.msra.mxu1 %v2944_v35 }
 0x14b   : > { %2495 = vmatprep.subr.bf16.mxu1 %v2478_v0  ;;  %2479 = vmatprep.subr.bf16.mxu0 %v2478_v0 }
 0x14d   : > { %2241 = vmatmul.mubr.msk.f32.vlgmr.msra.gmra.mrb[12].mxu0 %vm717_vm1, %v2967_v51  ;;  %2285 = vmatmul.mubr.msk.f32.vlgmr.msra.gmra.mrb[20].mxu1 %vm717_vm1, %v2967_v51 }
 0x14e   : > { %2243 = vmatprep.mubr.msk.f32.mxu0 %vm717_vm1, %v619_v57  ;;  %2287 = vmatprep.mubr.msk.f32.mxu1 %vm717_vm1, %v619_v57 }
 0x14f   : > { %2497 = vmatpush3.bf16.msra.mxu1 %v2478_v0  ;;  %2481 = vmatpush3.bf16.msra.mxu0 %v2478_v0 }
 0x150   : > { %2499 = vmatprep.subr.bf16.mxu1 %v2482_v3  ;;  %2483 = vmatprep.subr.bf16.mxu0 %v2482_v3 }
 0x151   : > { %2244 = vmatmul.mubr.msk.f32.gmra.mrb[14].mxu0 %vm717_vm1, %v2977_v55  ;;  %2288 = vmatmul.mubr.msk.f32.gmra.mrb[22].mxu1 %vm717_vm1, %v2977_v55 }
 0x153   : > { %2501 = vmatpush3.bf16.msra.mxu1 %v2482_v3  ;;  %2485 = vmatpush3.bf16.msra.mxu0 %v2482_v3 }
 0x154   : > { %2503 = vmatprep.subr.bf16.mxu1 %v2486_v6  ;;  %2487 = vmatprep.subr.bf16.mxu0 %v2486_v6 }
 0x157   : > { %2505 = vmatpush3.bf16.msra.mxu1 %v2486_v6  ;;  %2489 = vmatpush3.bf16.msra.mxu0 %v2486_v6 }
 0x158   : > { %2507 = vmatprep.subr.bf16.mxu1 %v2490_v9  ;;  %2491 = vmatprep.subr.bf16.mxu0 %v2490_v9 }
 0x15b   : > { %2509 = vmatpush3.bf16.msra.mxu1 %v2490_v9  ;;  %2493 = vmatpush3.bf16.msra.mxu0 %v2490_v9 }
 0x1f0   : > { %v2176_v10 = vpop.f32.mrb[8].mxu1 }
 0x1f1   : > { %v978_v11 = vpop.f32.mrb[9].mxu1 }
 0x1f4   : > { %v2179_v12 = vpop.f32.mrb[10].mxu1 }
 0x1f5   : > { %v988_v13 = vpop.f32.mrb[11].mxu1 }
 0x200   : > { %v2154_v14 = vpop.f32.mrb[8].mxu0  ;;  %v2198_v15 = vpop.f32.mrb[12].mxu1 }
 0x201   : > { %v1083_v16 = vsub.f32 %v2176_v10, %v2198_v15  ;;  %v893_v17 = vpop.f32.mrb[9].mxu0  ;;  %v1063_v18 = vpop.f32.mrb[13].mxu1  ;;  %v1479_v20 = vmul.f32 %v2154_v14, %v2154_v14 }
 0x202   : > { %v1082_v19 = vsub.f32 %v978_v11, %v1063_v18  ;;  %v1478_v22 = vmul.f32 %v893_v17, %v893_v17 }
 0x203   : > { %v1483_v21 = vmul.f32 %v1083_v16, %v1083_v16 }
 0x204   : > { %v1482_v23 = vmul.f32 %v1082_v19, %v1082_v19  ;;  %v2157_v24 = vpop.f32.mrb[10].mxu0  ;;  %v2201_v25 = vpop.f32.mrb[14].mxu1 }
 0x205   : > { %v1487_v26 = vadd.f32 %v1483_v21, %v1479_v20  ;;  %v1085_v27 = vsub.f32 %v2179_v12, %v2201_v25  ;;  %v903_v28 = vpop.f32.mrb[11].mxu0  ;;  %v1073_v29 = vpop.f32.mrb[15].mxu1  ;;  %v1481_v32 = vmul.f32 %v2157_v24, %v2157_v24 }
 0x206   : > { %v1486_v30 = vadd.f32 %v1482_v23, %v1478_v22  ;;  %v1084_v31 = vsub.f32 %v988_v13, %v1073_v29  ;;  %v1480_v34 = vmul.f32 %v903_v28, %v903_v28 }
 0x207   : > { %v1485_v33 = vmul.f32 %v1085_v27, %v1085_v27  ;;  %v1491_v42 = vadd.f32 0.0001, %v1487_v26 }
 0x208   : > { %v1484_v35 = vmul.f32 %v1084_v31, %v1084_v31  ;;  %v1490_v43 = vadd.f32 0.0001, %v1486_v30 }
 0x209   : > { %v1489_v36 = vadd.f32 %v1485_v33, %v1481_v32  ;;  %2566 = vrcp.f32 %v1491_v42 }
 0x20a   : > { %v1488_v37 = vadd.f32 %v1484_v35, %v1480_v34  ;;  %2568 = vrcp.f32 %v1490_v43 }
 0x20b   : > { %v1493_v44 = vadd.f32 0.0001, %v1489_v36 }
 0x20c   : > { %v1492_v45 = vadd.f32 0.0001, %v1488_v37 }
 0x20d   : > { %2570 = vrcp.f32 %v1493_v44 }
 0x20e   : > { %2572 = vrcp.f32 %v1492_v45 }
 0x210   : > { %v2264_v38 = vpop.f32.mrb[16].mxu1 }
 0x211   : > { %v1346_v39 = vpop.f32.mrb[17].mxu1 }
 0x213   : > { %v2567_v4 = vpop.eup %2566 }
 0x214   : > { %v2267_v40 = vpop.f32.mrb[18].mxu1  ;;  %v2569_v9 = vpop.eup %2568 }
 0x215   : > { %v1356_v41 = vpop.f32.mrb[19].mxu1 }
 0x217   : > { %v2571_v25 = vpop.eup %2570 }
 0x218   : > { %v2573_v33 = vpop.eup %2572 }
 0x220   : > { %v2242_v46 = vpop.f32.mrb[12].mxu0  ;;  %v2286_v47 = vpop.f32.mrb[20].mxu1 }
 0x221   : > { %v1455_v48 = vmul.f32 %v2242_v46, %v2154_v14  ;;  %v1467_v49 = vmul.f32 %v2242_v46, %v1083_v16  ;;  %v1451_v50 = vsub.f32 %v2264_v38, %v2286_v47  ;;  %v1261_v51 = vpop.f32.mrb[13].mxu0  ;;  %v1431_v52 = vpop.f32.mrb[21].mxu1 }
 0x222   : > { %v1454_v53 = vmul.f32 %v1261_v51, %v893_v17  ;;  %v1466_v54 = vmul.f32 %v1261_v51, %v1082_v19  ;;  %v1450_v55 = vsub.f32 %v1346_v39, %v1431_v52 }
 0x223   : > { %v1459_v56 = vmul.f32 %v1451_v50, %v1083_v16  ;;  %v1471_v57 = vmul.f32 %v2154_v14, %v1451_v50 }
 0x224   : > { %v1458_v58 = vmul.f32 %v1450_v55, %v1082_v19  ;;  %v1470_v59 = vmul.f32 %v1450_v55, %v893_v17  ;;  %v2245_v60 = vpop.f32.mrb[14].mxu0  ;;  %v2289_v61 = vpop.f32.mrb[22].mxu1 }
 0x225   : > { %v1463_v62 = vadd.f32 %v1459_v56, %v1455_v48  ;;  %v1475_v63 = vsub.f32 %v1467_v49, %v1471_v57  ;;  %v1457_v0 = vmul.f32 %v2245_v60, %v2157_v24  ;;  %v1469_v1 = vmul.f32 %v2245_v60, %v1085_v27  ;;  %v1271_v2 = vpop.f32.mrb[15].mxu0  ;;  %v1441_v3 = vpop.f32.mrb[23].mxu1 }
 0x226   : > { %v1462_v5 = vadd.f32 %v1458_v58, %v1454_v53  ;;  %v1474_v6 = vsub.f32 %v1466_v54, %v1470_v59  ;;  %v1453_v7 = vsub.f32 %v2267_v40, %v2289_v61  ;;  %v1456_v8 = vmul.f32 %v1271_v2, %v903_v28 }
 0x227   : > { %v1495_v10 = vadd.f32 0.0001, %v1463_v62  ;;  %v1507_v11 = vmul.f32 %v2567_v4, %v1475_v63  ;;  %v1468_v12 = vmul.f32 %v1271_v2, %v1084_v31  ;;  %v1452_v13 = vsub.f32 %v1356_v41, %v1441_v3 }
 0x228   : > { %v1494_v14 = vadd.f32 0.0001, %v1462_v5  ;;  %v1506_v15 = vmul.f32 %v2569_v9, %v1474_v6  ;;  %v1461_v16 = vmul.f32 %v1453_v7, %v1085_v27  ;;  %v1473_v17 = vmul.f32 %v2157_v24, %v1453_v7 }
 0x229   : > { %v1501_v18 = vmul.f32 %v2567_v4, %v1495_v10  ;;  %v1460_v19 = vmul.f32 %v1452_v13, %v1084_v31  ;;  %v1472_v20 = vmul.f32 %v1452_v13, %v903_v28  ;;  %v1523_v29 = vmul.f32 %v1507_v11, %v1507_v11 }
 0x22a   : > { %v1499_v21 = vmul.f32 %v2569_v9, %v1494_v14  ;;  %v1465_v22 = vadd.f32 %v1461_v16, %v1457_v0  ;;  %v1477_v23 = vsub.f32 %v1469_v1, %v1473_v17  ;;  %v1522_v35 = vmul.f32 %v1506_v15, %v1506_v15 }
 0x22b   : > { %v1519_v26 = vmul.f32 %v1501_v18, %v1501_v18  ;;  %v1464_v30 = vadd.f32 %v1460_v19, %v1456_v8  ;;  %v1476_v32 = vsub.f32 %v1468_v12, %v1472_v20 }
 0x22c   : > { %v1518_v34 = vmul.f32 %v1499_v21, %v1499_v21  ;;  %v1497_v36 = vadd.f32 0.0001, %v1465_v22  ;;  %v1509_v37 = vmul.f32 %v2571_v25, %v1477_v23  ;;  %2328 = vmatprep.mubr.msk.f32.mxu1 %vm717_vm1, %v1499_v21 }
 0x22d   : > { %v1527_v27 = vadd.f32 %v1523_v29, %v1519_v26  ;;  %v1496_v24 = vadd.f32 0.0001, %v1464_v30  ;;  %v1508_v38 = vmul.f32 %v2573_v33, %v1476_v32  ;;  %2329 = vmatmul.mubr.msk.f32.vlgmr.msra.gmra.mrb[24].mxu1 %vm717_vm1, %v1501_v18 }
 0x22e   : > { %v1505_v28 = vmul.f32 %v2571_v25, %v1497_v36  ;;  %v1526_v31 = vadd.f32 %v1522_v35, %v1518_v34  ;;  %v1525_v41 = vmul.f32 %v1509_v37, %v1509_v37 }
 0x22f   : > { %v1503_v39 = vmul.f32 %v2573_v33, %v1496_v24  ;;  %v1524_v43 = vmul.f32 %v1508_v38, %v1508_v38 }
 0x230   : > { %v1521_v40 = vmul.f32 %v1505_v28, %v1505_v28  ;;  %2306 = vmatprep.mubr.msk.f32.mxu0 %vm717_vm1, %v1526_v31 }
 0x231   : > { %v1520_v42 = vmul.f32 %v1503_v39, %v1503_v39  ;;  %2331 = vmatprep.mubr.msk.f32.mxu1 %vm717_vm1, %v1503_v39  ;;  %2307 = vmatmul.mubr.msk.f32.vlgmr.msra.gmra.mrb[16].mxu0 %vm717_vm1, %v1527_v27 }
 0x232   : > { %2332 = vmatmul.mubr.msk.f32.gmra.mrb[26].mxu1 %vm717_vm1, %v1505_v28  ;;  %v1529_v44 = vadd.f32 %v1525_v41, %v1521_v40 }
 0x233   : > { %v1528_v45 = vadd.f32 %v1524_v43, %v1520_v42 }
 0x235   : > { %2309 = vmatprep.mubr.msk.f32.mxu0 %vm717_vm1, %v1528_v45 }
 0x236   : > { %2310 = vmatmul.mubr.msk.f32.gmra.mrb[18].mxu0 %vm717_vm1, %v1529_v44 }
 0x300   : > { %v2330_v46 = vpop.f32.mrb[24].mxu1 }
 0x301   : > { %v1740_v47 = vsel %vm1627_vm2, %v2330_v46, 0.0  ;;  %v1720_v48 = vpop.f32.mrb[25].mxu1 }
 0x302   : > { %v1739_v49 = vsel %vm1627_vm2, %v1720_v48, 0.0 }
 0x303   : > { %v1741_v50 = vadd.f32 %v1740_v47, %v1739_v49 }
 0x304   : > { %v2308_v51 = vpop.f32.mrb[16].mxu0 }
 0x305   : > { %v1629_v52 = vsel %vm1627_vm2, %v2308_v51, 0.0  ;;  %v2333_v53 = vpop.f32.mrb[26].mxu1  ;;  %v1608_v54 = vpop.f32.mrb[17].mxu0 }
 0x306   : > { %v1628_v55 = vsel %vm1627_vm2, %v1608_v54, 0.0  ;;  %v1730_v56 = vpop.f32.mrb[27].mxu1  ;;  %v1744_v60 = vsel %vm1633_vm3, %v2333_v53, 0.0 }
 0x307   : > { %v1630_v57 = vadd.f32 %v1629_v52, %v1628_v55  ;;  %v1742_v58 = vsel %vm1627_vm2, %v1730_v56, 0.0 }
 0x308   : > { %v1743_v59 = vadd.f32 %v1742_v58, %v1741_v50 }
 0x309   : > { %v2311_v61 = vpop.f32.mrb[18].mxu0 }
 0x30a   : > { %v1745_v62 = vadd.f32 %v1744_v60, %v1743_v59  ;;  %v1618_v63 = vpop.f32.mrb[19].mxu0  ;;  %v1634_v3 = vsel %vm1633_vm3, %v2311_v61, 0.0 }
 0x30b   : > { %v1631_v0 = vsel %vm1627_vm2, %v1618_v63, 0.0 }
 0x30c   : > { %v1746_v1 = vrot.slane %v1745_v62, 4  ;;  %v1632_v2 = vadd.f32 %v1631_v0, %v1630_v57 }
 0x30e   : > { %v1747_v4 = vadd.f32 %v1746_v1, %v1745_v62  ;;  %v1635_v5 = vadd.f32 %v1634_v3, %v1632_v2 }
 0x310   : > { %v1748_v6 = vrot.slane %v1747_v4, 2  ;;  %v1636_v7 = vrot.slane %v1635_v5, 4 }
 0x312   : > { %v1749_v8 = vadd.f32 %v1748_v6, %v1747_v4  ;;  %v1637_v9 = vadd.f32 %v1636_v7, %v1635_v5 }
 0x314   : > { %v1750_v10 = vrot.slane %v1749_v8, 1  ;;  %v1638_v11 = vrot.slane %v1637_v9, 2 }
 0x316   : > { %v1751_v12 = vadd.f32 %v1750_v10, %v1749_v8  ;;  %v1639_v13 = vadd.f32 %v1638_v11, %v1637_v9 }
 0x318   : > { %v1753_v14 = vmul.f32 0.0010405828, %v1751_v12  ;;  %v1640_v15 = vrot.slane %v1639_v13, 1 }
 0x31a   : > { %v1641_v16 = vadd.f32 %v1640_v15, %v1639_v13  ;;  %v1754_v17 = vmul.f32 2.0, %v1753_v14 }
 0x31c   : > { %v1752_v18 = vmul.f32 0.0010405828, %v1641_v16 }
 0x31e   : > { %v1755_v19 = vsub.f32 %v1752_v18, %v1754_v17 }
 0x320   : > { %v1756_v20 = vadd.f32 1.0, %v1755_v19 }
 0x322   : > { %v1757_v21 = vmax.f32 %v1756_v20, 0.0 }
 0x324   : > { %2574 = vrsqrt.f32 %v1757_v21  ;;  %vm1760_vm4 = vcmp.eq.f32.partialorder %v1757_v21, inf  ;;  %v1763_v25 = vand.u32 2147483648, %v1757_v21  ;;  %vm1762_vm5 = vcmp.eq.f32.partialorder %v1757_v21, 0.0 }
 0x32e   : > { %v2575_v22 = vpop.eup %2574 }
 0x32f   : > { %v1759_v23 = vmul.f32 %v2575_v22, %v1757_v21 }
 0x331   : > { %v1761_v26 = vsel %vm1760_vm4, %v1757_v21, %v1759_v23 }
 0x332   : > { %v1764_v29 = vsel %vm1762_vm5, %v1763_v25, %v1761_v26 }
 0x333   : > { %v1765_v30 = vmul.f32 0.5, %v1764_v29 }
 0x335   : > { %1767 = vst.msk [vmem:[%s310_s9] sm:$0x1] %vm1766_vm6, %v1765_v30 }
 0x336   : > { %2619 = shalt.err (!%p2616_p4)
}
 0x337   : > { %s2620_s16 = scalar_lea.hbm %s3086_s11, 16  ;;  %s2624_s19 = scalar_lea.hbm %s3137_s7, 32 }
 0x338   : > { %p2621_p5 = scmp.ne.s32.totalorder %s3086_s11, %s2620_s16  ;;  %p2625_p1 = scmp.lt.u32.totalorder %s3086_s11, %s3137_s7 }
 0x339   : > { %p2626_p3 = scmp.lt.u32.totalorder %s2624_s19, %s2620_s16  ;;  %p2628_p6 = scmp.lt.u32.totalorder %s2620_s16, %s3086_s11 }
 0x33a   : > { %p2622_p7 = pnand %p2621_p5, %p3144_p12 }
 0x33b   : > { %p2627_p11 = por %p2626_p3, %p2625_p1 }
 0x33c   : > { %p2623_p9 = pneg %p2622_p7 }
 0x33d   : > { %p2629_p13 = por %p2628_p6, %p2627_p11 }
 0x33f   : > { %p2630_p8 = pnand %p2629_p13, %p2623_p9 }
 0x341   : > { %2633 = shalt.err (!%p2630_p8)
}
 0x342   : > { %2520 = dma.vmem_to_hbm [thread:$0]  (%p3144_p12), %s3088_s12, 16, %s3086_s11, %s1769_s17  }
 0x343 PF: > { %s1793_s8 = sand.u32 1, %s2660_s24   ;;  %p3145_p10 = scmp.ne.s32.totalorder %s3142_s14, 0 }
 0x344   : > { %p3146_p0 = scmp.ge.s32.totalorder %s2672_s27, 2  ;;  %s1794_s15 = scalar_lea.sflag [#allocation4], %s1793_s8 }
 0x346   : > { %p2527_p2 = pnand %p3146_p0, %p3145_p10 }
 0x348   : > { %2655 = dma.done.wait (!%p2527_p2), %s1794_s15, 16  }
 0x349   : > { %2657 = vsyncadd (!%p2527_p2), %s1794_s15, 4294967280  ;;  %p20_p4 = scmp.ge.s32.totalorder %s2743_s30, 4   ;;  %s3147_s24 = smov %s2664_s25 }
 0x34a   : > { %s3148_s25 = smov %s2668_s26  ;;  %s3149_s26 = smov %s2755_s10 }
 0x34b   : > { %s3150_s27 = smov %s2743_s30  ;;  %22 = sbr.rel (!%p20_p4) target bundleno = 5 (0x5), region = 96 }
 0x352   :  { %1798 = vsyncpa [#allocation3], 1 }
 0x353   :  { %1800 = vsyncpa [#allocation3 + $0x1], 1 }
 0x354   :  { %1801 = vsyncpa [#allocation4], 1 }
 0x355   :  { %1803 = vsyncpa [#allocation4 + $0x1], 1 }

</bundles_post_ra>
